<compile_context>
chip_gen: v7x
topology: tpu7x:2x2x1
jax: 0.10.0
libtpu: 0.0.40
codegen_flags: <defaults>
</compile_context>

<pallas_src>
import jax
import jax.numpy as jnp
from jax.experimental import pallas as pl
from jax.experimental.pallas import tpu as pltpu

# ---------------- model dimensions (match the PyTorch __init__) --------------
VISION_FEAT = 512                       # resnet18 fc.in_features
TEXT_FEAT   = 768                       # bert-base-uncased hidden_size
VISION_DIM  = 256
TEXT_DIM    = 256
HIDDEN      = 128
N_ACTIONS   = 4
HEAD_PAD    = 128                       # lane-padded fused actor|critic head width
TRUNK_IN    = VISION_FEAT + TEXT_FEAT   # 1280 = concatenated raw-feature width
TILE_ROWS   = 16                        # rows per grid step (full bf16 sublane tile)


def agent_kernel(x_ref,                 # (TILE_ROWS, 1280) bf16 concat features
                 w_trunk_ref, b_trunk_ref,   # (1280,128) bf16, (1,128) f32
                 w_head_ref, b_head_ref,     # (128,128)  f32,  (1,128) f32
                 out_ref):                   # (TILE_ROWS, 128) f32 packed slab
    # Folded trunk: relu(concat(vfeat,tcls) @ W_trunk + b_trunk), f32 accumulation.
    pre = (jnp.dot(x_ref[...], w_trunk_ref[...],
                   preferred_element_type=jnp.float32)
           + b_trunk_ref[...])
    h = jnp.maximum(pre, 0.0)                               # (rows, 128) f32

    # Fused actor+critic head (f32 for logit/value precision): lanes [0:4] are
    # actor logits, lane 4 is the critic value, lanes 5..127 are zero-padded.
    raw = (jnp.dot(h, w_head_ref[...], preferred_element_type=jnp.float32)
           + b_head_ref[...])                               # (rows, 128) f32

    # log-softmax over the actor lanes only (Categorical(logits=...) normalization).
    col = jax.lax.broadcasted_iota(jnp.int32, raw.shape, 1)
    is_action = col < N_ACTIONS
    masked = jnp.where(is_action, raw, -jnp.inf)
    m = jnp.max(masked, axis=-1, keepdims=True)
    lse = jnp.log(jnp.sum(jnp.exp(masked - m), axis=-1, keepdims=True)) + m

    # Pack: action lanes -> normalized log-probs; other lanes keep raw values
    # (lane 4 = critic value, pad lanes stay 0). Single lane-dense store.
    out_ref[...] = jnp.where(is_action, raw - lse, raw)


def make_params(key):
    """Synthetic PyTorch-Linear params + folded/fused kernel params."""
    ks = jax.random.split(key, 10)

    def lin(kw, kb, fan_in, fan_out):
        bound = 1.0 / jnp.sqrt(fan_in)
        w = jax.random.uniform(kw, (fan_in, fan_out), jnp.float32, -bound, bound)
        b = jax.random.uniform(kb, (1, fan_out), jnp.float32, -bound, bound)
        return w, b

    wv, bv = lin(ks[0], ks[1], VISION_FEAT, VISION_DIM)        # backbone.fc
    wt, bt = lin(ks[2], ks[3], TEXT_FEAT, TEXT_DIM)            # text proj
    ws, bs = lin(ks[4], ks[5], VISION_DIM + TEXT_DIM, HIDDEN)  # shared[0]
    wa, ba = lin(ks[6], ks[7], HIDDEN, N_ACTIONS)              # actor
    wc, bc = lin(ks[8], ks[9], HIDDEN, 1)                      # critic

    raw = dict(wv=wv, bv=bv, wt=wt, bt=bt, ws=ws, bs=bs,
               wa=wa, ba=ba, wc=wc, bc=bc)

    # ---- offline algebraic folding of the projection layers (exact, f32) ----
    # concat(vfeat, tcls) @ W_trunk == vfeat @ (Wv@Ws[:256]) + tcls @ (Wt@Ws[256:])
    wsv, wst = ws[:VISION_DIM], ws[VISION_DIM:]
    w_trunk = jnp.concatenate([wv @ wsv, wt @ wst], axis=0)    # (1280, 128)
    b_trunk = bv @ wsv + bt @ wst + bs                         # (1, 128)

    # ---- fuse + lane-pad actor/critic head (kept f32: feeds log_softmax) ----
    w_head = jnp.zeros((HIDDEN, HEAD_PAD), jnp.float32)
    w_head = w_head.at[:, :N_ACTIONS].set(wa)
    w_head = w_head.at[:, N_ACTIONS:N_ACTIONS + 1].set(wc)
    b_head = jnp.zeros((1, HEAD_PAD), jnp.float32)
    b_head = b_head.at[:, :N_ACTIONS].set(ba)
    b_head = b_head.at[:, N_ACTIONS:N_ACTIONS + 1].set(bc)

    folded = dict(
        w_trunk=w_trunk.astype(jnp.bfloat16),   # bf16 weights, f32 MXU accumulation
        b_trunk=b_trunk,                        # biases f32 (post-accumulation add)
        w_head=w_head,                          # f32 head for logit/value precision
        b_head=b_head,
    )
    return folded, raw


def research_agent_forward(vision_features, text_cls_features, p):
    B = vision_features.shape[0]
    # Original PyTorch forward concats a batch-1 text embedding with the vision
    # batch; broadcast explicitly so both operands share the row dimension.
    if text_cls_features.shape[0] == 1 and B > 1:
        text_cls_features = jnp.broadcast_to(text_cls_features, (B, TEXT_FEAT))

    # One upstream cast + concat -> lane/sublane friendly (B, 1280) bf16 slab.
    x = jnp.concatenate([vision_features, text_cls_features],
                        axis=1).astype(jnp.bfloat16)
    b_pad = pl.cdiv(B, TILE_ROWS) * TILE_ROWS
    if b_pad != B:
        x = jnp.pad(x, ((0, b_pad - B), (0, 0)))
    n_tiles = b_pad // TILE_ROWS

    bytes_accessed = (TRUNK_IN * HIDDEN * 2          # bf16 trunk weight (resident)
                      + HIDDEN * HEAD_PAD * 4        # f32 head weight
                      + 2 * HEAD_PAD * 4             # biases
                      + b_pad * TRUNK_IN * 2         # bf16 features
                      + b_pad * HEAD_PAD * 4)        # f32 output slab

    out = pl.pallas_call(
        agent_kernel,
        grid_spec=pltpu.PrefetchScalarGridSpec(
            num_scalar_prefetch=0,
            grid=(n_tiles,),
            in_specs=[
                # per-tile features: auto double-buffered across grid steps
                pl.BlockSpec((TILE_ROWS, TRUNK_IN), lambda i: (i, 0)),
                # weights/biases: constant block index -> DMA'd once, resident
                pl.BlockSpec((TRUNK_IN, HIDDEN), lambda i: (0, 0)),
                pl.BlockSpec((1, HIDDEN), lambda i: (0, 0)),
                pl.BlockSpec((HIDDEN, HEAD_PAD), lambda i: (0, 0)),
                pl.BlockSpec((1, HEAD_PAD), lambda i: (0, 0)),
            ],
            out_specs=pl.BlockSpec((TILE_ROWS, HEAD_PAD), lambda i: (i, 0)),
        ),
        out_shape=jax.ShapeDtypeStruct((b_pad, HEAD_PAD), jnp.float32),
        compiler_params=pltpu.CompilerParams(
            dimension_semantics=("parallel",)),     # split row tiles across TCs (v7x)
        cost_estimate=pl.CostEstimate(
            flops=2 * b_pad * (TRUNK_IN * HIDDEN + HIDDEN * HEAD_PAD),
            transcendentals=b_pad * N_ACTIONS,
            bytes_accessed=bytes_accessed),
    )(x, p["w_trunk"], p["b_trunk"], p["w_head"], p["b_head"])

    logits = out[:B, :N_ACTIONS]
    value = out[:B, N_ACTIONS:N_ACTIONS + 1]
    return logits, value


def reference_forward(vfeat, tcls, raw):
    """Pure-JAX f32 reference of the original (unfolded) forward."""
    B = vfeat.shape[0]
    if tcls.shape[0] == 1 and B > 1:
        tcls = jnp.broadcast_to(tcls, (B, TEXT_FEAT))
    v_emb = vfeat @ raw["wv"] + raw["bv"]
    t_emb = tcls @ raw["wt"] + raw["bt"]
    x = jnp.concatenate([v_emb, t_emb], axis=1)
    h = jnp.maximum(x @ raw["ws"] + raw["bs"], 0.0)
    logits = jax.nn.log_softmax(h @ raw["wa"] + raw["ba"], axis=-1)
    value = h @ raw["wc"] + raw["bc"]
    return logits, value


if __name__ == "__main__":
    BATCH = 32          # e.g. a small batch of rollout observations -> grid=(2,)

    key = jax.random.PRNGKey(0)
    k_param, k_vis, k_txt = jax.random.split(key, 3)

    params, raw = make_params(k_param)

    # Synthetic backbone outputs (what ResNet-18 pooling / BERT [CLS] would emit).
    vision_features = jax.random.normal(k_vis, (BATCH, VISION_FEAT), jnp.float32)
    text_cls_features = jax.random.normal(k_txt, (1, TEXT_FEAT), jnp.float32)

    logits, value = research_agent_forward(vision_features, text_cls_features, params)
    jax.block_until_ready((logits, value))

    assert logits.shape == (BATCH, N_ACTIONS)
    assert value.shape == (BATCH, 1)
    # Categorical(logits=...) stores normalized logits: probs sum to 1.
    assert jnp.allclose(jnp.sum(jnp.exp(logits), axis=-1), 1.0, atol=1e-5)

    # Match the f32 un-folded reference (bf16 trunk weights/features -> small drift).
    ref_logits, ref_value = reference_forward(vision_features, text_cls_features, raw)
    assert jnp.allclose(logits, ref_logits, atol=5e-2), \
        f"logits max err {float(jnp.max(jnp.abs(logits - ref_logits)))}"
    assert jnp.allclose(value, ref_value, atol=5e-2), \
        f"value max err {float(jnp.max(jnp.abs(value - ref_value)))}"

    print("KERNEL_OK")
</pallas_src>

<mosaic_0001>
module attributes {stable_mosaic.version = 11 : i64} {
  func.func @agent_kernel(%arg0: i32, %arg1: memref<16x1280xbf16, #tpu.memory_space<vmem>>, %arg2: memref<1280x128xbf16, #tpu.memory_space<vmem>>, %arg3: memref<1x128xf32, #tpu.memory_space<vmem>>, %arg4: memref<128x128xf32, #tpu.memory_space<vmem>>, %arg5: memref<1x128xf32, #tpu.memory_space<vmem>>, %arg6: memref<16x128xf32, #tpu.memory_space<vmem>>) attributes {dimension_semantics = [#tpu.dimension_semantics<parallel>], iteration_bounds = array<i64: 2>, scalar_prefetch = 0 : i64, scratch_operands = 0 : i64, tpu.core_type = #tpu.core_type<tc>, window_params = [{transform_indices = @transform_0, window_bounds = array<i64: 16, 1280>}, {pipeline_mode = #tpu.pipeline_mode<synchronous>, transform_indices = @transform_1, window_bounds = array<i64: 1280, 128>}, {pipeline_mode = #tpu.pipeline_mode<synchronous>, transform_indices = @transform_2, window_bounds = array<i64: 1, 128>}, {pipeline_mode = #tpu.pipeline_mode<synchronous>, transform_indices = @transform_3, window_bounds = array<i64: 128, 128>}, {pipeline_mode = #tpu.pipeline_mode<synchronous>, transform_indices = @transform_4, window_bounds = array<i64: 1, 128>}, {transform_indices = @transform_5, window_bounds = array<i64: 16, 128>}]} {
    %c0 = arith.constant 0 : index
    %c0_0 = arith.constant 0 : index
    %0 = vector.load %arg1[%c0, %c0_0] : memref<16x1280xbf16, #tpu.memory_space<vmem>>, vector<16x1280xbf16>
    %c0_1 = arith.constant 0 : index
    %c0_2 = arith.constant 0 : index
    %1 = vector.load %arg2[%c0_1, %c0_2] : memref<1280x128xbf16, #tpu.memory_space<vmem>>, vector<1280x128xbf16>
    %cst = arith.constant dense<0.000000e+00> : vector<16x128xf32>
    %2 = tpu.matmul %0, %1, %cst {dimension_numbers = #tpu.dot_dimension_numbers<[1], [0], [0], [1], [0, 0, 1, 1], [], []>} : vector<16x1280xbf16>, vector<1280x128xbf16>, vector<16x128xf32> -> vector<16x128xf32>
    %c0_3 = arith.constant 0 : index
    %c0_4 = arith.constant 0 : index
    %3 = vector.load %arg3[%c0_3, %c0_4] : memref<1x128xf32, #tpu.memory_space<vmem>>, vector<1x128xf32>
    %4 = vector.broadcast %3 : vector<1x128xf32> to vector<16x128xf32>
    %5 = arith.addf %2, %4 : vector<16x128xf32>
    %cst_5 = arith.constant 0.000000e+00 : f32
    %6 = vector.broadcast %cst_5 : f32 to vector<16x128xf32>
    %7 = arith.maximumf %5, %6 : vector<16x128xf32>
    %c0_6 = arith.constant 0 : index
    %c0_7 = arith.constant 0 : index
    %8 = vector.load %arg4[%c0_6, %c0_7] : memref<128x128xf32, #tpu.memory_space<vmem>>, vector<128x128xf32>
    %cst_8 = arith.constant dense<0.000000e+00> : vector<16x128xf32>
    %9 = tpu.matmul %7, %8, %cst_8 {dimension_numbers = #tpu.dot_dimension_numbers<[1], [0], [0], [1], [0, 0, 1, 1], [], []>} : vector<16x128xf32>, vector<128x128xf32>, vector<16x128xf32> -> vector<16x128xf32>
    %c0_9 = arith.constant 0 : index
    %c0_10 = arith.constant 0 : index
    %10 = vector.load %arg5[%c0_9, %c0_10] : memref<1x128xf32, #tpu.memory_space<vmem>>, vector<1x128xf32>
    %11 = vector.broadcast %10 : vector<1x128xf32> to vector<16x128xf32>
    %12 = arith.addf %9, %11 : vector<16x128xf32>
    %13 = tpu.iota {dimensions = array<i32: 1>} : vector<16x128xi32>
    %c4_i32 = arith.constant 4 : i32
    %14 = vector.broadcast %c4_i32 : i32 to vector<16x128xi32>
    %15 = arith.cmpi slt, %13, %14 : vector<16x128xi32>
    %cst_11 = arith.constant 0xFF800000 : f32
    %16 = vector.broadcast %cst_11 : f32 to vector<16x128xf32>
    %17 = arith.select %15, %12, %16 : vector<16x128xi1>, vector<16x128xf32>
    %cst_12 = arith.constant dense<0xFF800000> : vector<16xf32>
    %18 = vector.multi_reduction <maximumf>, %17, %cst_12 [1] : vector<16x128xf32> to vector<16xf32>
    %19 = vector.shape_cast %18 : vector<16xf32> to vector<16x1xf32>
    %20 = vector.broadcast %19 : vector<16x1xf32> to vector<16x128xf32>
    %21 = arith.subf %17, %20 : vector<16x128xf32>
    %22 = math.exp %21 : vector<16x128xf32>
    %cst_13 = arith.constant dense<0.000000e+00> : vector<16xf32>
    %23 = vector.multi_reduction <add>, %22, %cst_13 [1] : vector<16x128xf32> to vector<16xf32>
    %24 = vector.shape_cast %23 : vector<16xf32> to vector<16x1xf32>
    %25 = math.log %24 : vector<16x1xf32>
    %26 = arith.addf %25, %19 : vector<16x1xf32>
    %27 = vector.broadcast %26 : vector<16x1xf32> to vector<16x128xf32>
    %28 = arith.subf %12, %27 : vector<16x128xf32>
    %29 = arith.select %15, %28, %12 : vector<16x128xi1>, vector<16x128xf32>
    %c0_14 = arith.constant 0 : index
    %c0_15 = arith.constant 0 : index
    %30 = vector.load %arg6[%c0_14, %c0_15] : memref<16x128xf32, #tpu.memory_space<vmem>>, vector<16x128xf32>
    tpu.vector_store %arg6[%c0_14, %c0_15], %29 {strides = array<i32>} : memref<16x128xf32, #tpu.memory_space<vmem>>, vector<16x128xf32>,
    return
  }
  func.func @transform_0(%arg0: i32) -> (i32, i32) {
    %c0_i32 = arith.constant 0 : i32
    %c0_i32_0 = arith.constant 0 : i32
    return %arg0, %c0_i32 : i32, i32
  }
  func.func @transform_1(%arg0: i32) -> (i32, i32) {
    %c0_i32 = arith.constant 0 : i32
    %c0_i32_0 = arith.constant 0 : i32
    %c0_i32_1 = arith.constant 0 : i32
    return %c0_i32, %c0_i32_0 : i32, i32
  }
  func.func @transform_2(%arg0: i32) -> (i32, i32) {
    %c0_i32 = arith.constant 0 : i32
    %c0_i32_0 = arith.constant 0 : i32
    %c0_i32_1 = arith.constant 0 : i32
    return %c0_i32, %c0_i32_0 : i32, i32
  }
  func.func @transform_3(%arg0: i32) -> (i32, i32) {
    %c0_i32 = arith.constant 0 : i32
    %c0_i32_0 = arith.constant 0 : i32
    %c0_i32_1 = arith.constant 0 : i32
    return %c0_i32, %c0_i32_0 : i32, i32
  }
  func.func @transform_4(%arg0: i32) -> (i32, i32) {
    %c0_i32 = arith.constant 0 : i32
    %c0_i32_0 = arith.constant 0 : i32
    %c0_i32_1 = arith.constant 0 : i32
    return %c0_i32, %c0_i32_0 : i32, i32
  }
  func.func @transform_5(%arg0: i32) -> (i32, i32) {
    %c0_i32 = arith.constant 0 : i32
    %c0_i32_0 = arith.constant 0 : i32
    return %arg0, %c0_i32 : i32, i32
  }
}

</mosaic_0001>

<bundles_post_ra>
// kernel: tpu_custom_call.1
= control target key start
LH: loop header
LB: loop body
LE: loop exit
PB: predicated region body
PF: predicated region fallthrough
CT: control target
= control target key end

     0   :  { %10 = vsyncpa [#allocation3], 0  ;;  %s2368_s0 = inlined_call_operand.hbm [shape: bf16[32,1280], index: 0, kind: input, shape index: {}]   ;;  %s2369_s1 = inlined_call_operand.hbm [shape: bf16[1280,128], index: 1, kind: input, shape index: {}]   ;;  %s2370_s2 = inlined_call_operand.vmem [shape: f32[1,128], index: 2, kind: input, shape index: {}]   ;;  %s2371_s3 = inlined_call_operand.hbm [shape: f32[128,128], index: 3, kind: input, shape index: {}]   ;;  %s2372_s4 = inlined_call_operand.vmem [shape: f32[1,128], index: 4, kind: input, shape index: {}]   ;;  %s2373_s5 = inlined_call_operand.hbm [shape: f32[32,128], index: 5, kind: output, shape index: {}]  }
   0x1   :  { %12 = vsyncpa [#allocation3 + $0x1], 0 }
   0x2   :  { %13 = vsyncpa [#allocation6], 0 }
   0x3   :  { %14 = vsyncpa [#allocation4], 0 }
   0x4   :  { %16 = vsyncpa [#allocation4 + $0x1], 0  ;;  %s2111_s18 = smov 0   ;;  %s2113_s19 = smov 0  }
   0x5   :  { %s2115_s20 = smov 0   ;;  %s2117_s21 = smov 0  }
   0x6 LB: > { %s2132_s22 = sadd.s32 4294967295, %s2067_s21   ;;  %s1425_s23 = sadd.s32 4294967294, %s2067_s21   ;;  %s2067_s21 = sphi %s2117_s21, %s2393_s21   ;;  %s2063_s20 = sphi %s2115_s20, %s2392_s20   ;;  %s2059_s19 = sphi %s2113_s19, %s2391_s19   ;;  %s2055_s18 = sphi %s2111_s18, %s2390_s18  }
   0x7   : > { %p42_p0 = scmp.ne.s32.totalorder %s2059_s19, %s2055_s18  ;;  %p2374_p1 = scmp.eq.s32.totalorder %s2132_s22, 0 }
   0x8   : > { %p156_p3 = scmp.eq.s32.totalorder %s1425_s23, 1  ;;  %p1426_p5 = scmp.ge.s32.totalorder %s2067_s21, 1 }
   0x9   : > { %p2141_p4 = por %p2374_p1, %p42_p0  ;;  %p163_p7 = scmp.lt.s32.totalorder %s2067_s21, 3 }
   0xa   : > { %p2146_p6 = por %p156_p3, %p42_p0  ;;  %s2069_s27 = smov [#allocation5]  }
   0xb   : > { %s2377_s24 = scalar_select %p2141_p4, 1, 0 }
   0xc   : > { %s2378_s25 = scalar_select %p2146_p6, 1, 0 }
   0xd   : > { %p2151_p8 = pnand %p1426_p5, %p163_p7  ;;  %s175_s28 = sshll.u32 %s2069_s27, 4  ;;  %s2155_s28 = int_to_ptr.vmem [resolvable:$true] %s175_s28 }
   0xe   : > { %s2070_s30 = smov [#allocation7]   ;;  %s1911_s9 = scalar_lea.hbm %s2369_s1, 10240 }
   0xf   : > { %p1745_p9 = pneg %p2151_p8  ;;  %s191_s6 = sshll.u32 %s2070_s30, 4  ;;  %s2166_s6 = int_to_ptr.vmem [resolvable:$true] %s191_s6 }
  0x10   : > { %p1912_p12 = scmp.ne.s32.totalorder %s2369_s1, %s1911_s9  ;;  %p1918_p5 = scmp.lt.u32.totalorder %s1911_s9, %s2369_s1 }
  0x11   : > { %p2162_p11 = pnand %p1745_p9, %p2374_p1 }
  0x13   : > { %p1913_p13 = pneg %p2162_p11 }
  0x15   : > { %p1914_p0 = pnand %p1913_p13, %p1912_p12 }
  0x17   : > { %p1915_p3 = pneg %p1914_p0 }
  0x19   : > { %p1920_p7 = pnand %p1918_p5, %p1915_p3 }
  0x1b   : > { %1923 = shalt.err (!%p1920_p7)
}
  0x1c   : > { %s1924_s14 = scalar_lea.vmem %s2155_s28, 10240  ;;  %p1932_p2 = scmp.lt.s32.totalorder %s2155_s28, %s2155_s28 }
  0x1d   : > { %p1925_p9 = scmp.ne.s32.totalorder %s2155_s28, %s1924_s14  ;;  %p1933_p12 = scmp.lt.s32.totalorder %s1924_s14, %s1924_s14 }
  0x1f   : > { %p1927_p10 = pnand %p1925_p9, %p1913_p13  ;;  %p1934_p0 = por %p1933_p12, %p1932_p2 }
  0x21   : > { %p1928_p1 = pneg %p1927_p10 }
  0x23   : > { %p1935_p6 = pnand %p1934_p0, %p1928_p1 }
  0x25   : > { %1938 = shalt.err (!%p1935_p6)
}
  0x26   : > { %s2071_s15 = smov 64   ;;  %s2072_s16 = smov 4  }
  0x27   : > { %1748 = dma.hbm_to_vmem [thread:$0]  (!%p2162_p11), %s2369_s1, 10240, %s2155_s28, [#allocation6], %s2071_s15, %s2071_s15, %s2072_s16  }
  0x28   : > { %s1939_s7 = scalar_lea.hbm %s2371_s3, 2048 }
  0x29   : > { %p1940_p2 = scmp.ne.s32.totalorder %s2371_s3, %s1939_s7  ;;  %p1946_p10 = scmp.lt.u32.totalorder %s1939_s7, %s2371_s3 }
  0x2b   : > { %p1942_p1 = pnand %p1940_p2, %p1913_p13 }
  0x2d   : > { %p1943_p6 = pneg %p1942_p1 }
  0x2f   : > { %p1948_p3 = pnand %p1946_p10, %p1943_p6 }
  0x31   : > { %1951 = shalt.err (!%p1948_p3)
}
  0x32   : > { %s1952_s28 = scalar_lea.vmem %s2166_s6, 2048  ;;  %p1960_p12 = scmp.lt.s32.totalorder %s2166_s6, %s2166_s6 }
  0x33   : > { %p1953_p5 = scmp.ne.s32.totalorder %s2166_s6, %s1952_s28  ;;  %p1961_p0 = scmp.lt.s32.totalorder %s1952_s28, %s1952_s28 }
  0x35   : > { %p1955_p7 = pnand %p1953_p5, %p1913_p13  ;;  %p1962_p2 = por %p1961_p0, %p1960_p12 }
  0x37   : > { %p1956_p9 = pneg %p1955_p7 }
  0x39   : > { %p1963_p1 = pnand %p1962_p2, %p1956_p9 }
  0x3b   : > { %1966 = shalt.err (!%p1963_p1)
}
  0x3c   : > { %s2073_s12 = smov 128   ;;  %s2074_s13 = smov 8  }
  0x3d   : > { %1751 = dma.hbm_to_vmem [thread:$0]  (!%p2162_p11), %s2371_s3, 2048, %s2166_s6, [#allocation6], %s2073_s12, %s2073_s12, %s2074_s13  }
  0x3e   : > { %s2221_s16 = sadd.s32 1, %s2067_s21   ;;  %s29_s23 = sadd.s32 1, %s2063_s20 }
  0x3f   : > { %s26_s17 = ssub.s32 %s2067_s21, %s2221_s16  ;;  %p36_p6 = scmp.ne.s32.totalorder %s2063_s20, %s2059_s19 }
  0x40   : > { %p27_p13 = scmp.eq.s32.totalorder %s26_s17, 0  ;;  %p37_p10 = scmp.eq.s32.totalorder %s2067_s21, 0 }
  0x41   : > { %p2381_p5 = scmp.eq.s32.totalorder %s2132_s22, 1  ;;  %p1762_p9 = scmp.lt.s32.totalorder %s2067_s21, 2 }
  0x42   : > { %s2230_s27 = scalar_select %p27_p13, %s2063_s20, %s29_s23  }
  0x43   : > { %p38_p3 = por %p37_p10, %p36_p6  ;;  %p2234_p7 = por %p2381_p5, %p36_p6 }
  0x44   : > { %s208_s29 = sand.u32 1, %s2063_s20   ;;  %s1731_s6 = smul.u32 1280, %s2067_s21 }
  0x45   : > { %s2382_s30 = scalar_select %p2234_p7, 1, 0 }
  0x46   : > { %s1730_s7 = smul.u32 80, %s208_s29  ;;  %p2241_p11 = pnand %p1762_p9, %p38_p3 }
  0x47   : > { %s2248_s11 = scalar_lea.hbm %s2368_s0, %s1731_s6  ;;  %s2252_s13 = scalar_lea.sflag [#allocation3], %s208_s29 }
  0x48   : > { %s212_s28 = scalar_lea.vmem [#allocation2], %s1730_s7  ;;  %s1967_s14 = scalar_lea.hbm %s2248_s11, 1280 }
  0x49   : > { %s220_s12 = sshll.u32 %s212_s28, 4  ;;  %p1968_p12 = scmp.ne.s32.totalorder %s2248_s11, %s1967_s14  ;;  %s2250_s12 = int_to_ptr.vmem [resolvable:$true] %s220_s12 }
  0x4a   : > { %p1969_p0 = pneg %p2241_p11  ;;  %s1972_s23 = scalar_lea.hbm %s2368_s0, 2560 }
  0x4b   : > { %p1973_p13 = scmp.lt.u32.totalorder %s2248_s11, %s2368_s0  ;;  %p1974_p6 = scmp.lt.u32.totalorder %s1972_s23, %s1967_s14 }
  0x4c   : > { %p1970_p2 = pnand %p1969_p0, %p1968_p12  ;;  %p1976_p3 = scmp.lt.u32.totalorder %s1967_s14, %s2248_s11 }
  0x4d   : > { %p1975_p10 = por %p1974_p6, %p1973_p13 }
  0x4e   : > { %p1971_p1 = pneg %p1970_p2 }
  0x4f   : > { %p1977_p5 = por %p1976_p3, %p1975_p10 }
  0x51   : > { %p1978_p9 = pnand %p1977_p5, %p1971_p1 }
  0x53   : > { %1981 = shalt.err (!%p1978_p9)
}
  0x54   : > { %s1982_s29 = scalar_lea.vmem %s2250_s12, 1280  ;;  %s2075_s7 = smov [#allocation2]  }
  0x55   : > { %p1983_p12 = scmp.ne.s32.totalorder %s2250_s12, %s1982_s29  ;;  %s1987_s10 = sshll.u32 %s2075_s7, 4  ;;  %s1988_s10 = int_to_ptr.vmem [resolvable:$false] %s1987_s10 }
  0x56   : > { %s1989_s28 = scalar_lea.vmem %s1988_s10, 2560  ;;  %p1990_p4 = scmp.lt.s32.totalorder %s2250_s12, %s1988_s10 }
  0x57   : > { %p1985_p2 = pnand %p1983_p12, %p1969_p0  ;;  %p1991_p13 = scmp.lt.s32.totalorder %s1989_s28, %s1982_s29 }
  0x59   : > { %p1986_p7 = pneg %p1985_p2  ;;  %p1992_p6 = por %p1991_p13, %p1990_p4 }
  0x5b   : > { %p1993_p10 = pnand %p1992_p6, %p1986_p7 }
  0x5d   : > { %1996 = shalt.err (!%p1993_p10)
}
  0x5e   : > { %s2076_s14 = smov 640   ;;  %s2077_s15 = smov 40  }
  0x5f   : > { %1755 = dma.hbm_to_vmem [thread:$0]  (!%p2241_p11), %s2248_s11, 1280, %s2250_s12, %s2252_s13, %s2076_s14, %s2076_s14, %s2077_s15  }
  0x60   : > { %232 = sbr.rel (%p2151_p8) target bundleno = 977 (0x3d1), region = 40  ;;  %s2283_s17 = sand.u32 (!%p2151_p8), 1, %s2059_s19  }
  0x61   : > { %s1732_s23 = smul.u32 (!%p2151_p8), 80, %s2283_s17  ;;  %s235_s6 = scalar_lea.sflag (!%p2151_p8), [#allocation3], %s2283_s17 }
  0x62   : > { %p2384_p4 = scmp.ne.s32.totalorder (!%p2151_p8), %s2377_s24, 0 }
  0x63   : > { %s2287_s9 = scalar_lea.vmem (!%p2151_p8), [#allocation2], %s1732_s23 }
  0x67   : > { %2042 = dma.done.wait (%p2384_p4), %s235_s6, 1280  }
  0x68   : > { %2044 = vsyncadd (%p2384_p4), %s235_s6, 4294966016  ;;  %p2385_p7 = scmp.eq.s32.totalorder %s2132_s22, 0 }
  0x6a   : > { %2046 = dma.done.wait (%p2385_p7), [#allocation6], 12288   ;;  %p2386_p8 = pmov %p2385_p7 }
  0x6b   : > { %v1808_v0 = vld [vmem:[#allocation5 + $0x40] sm:$0xff]   ;;  %v1812_v4 = vld [vmem:[#allocation5 + $0x48] sm:$0xff]   ;;  %v1816_v8 = vld [vmem:[#allocation5 + $0x50] sm:$0xff]   ;;  %s1436_s12 = sshll.u32 %s2283_s17, 4  ;;  %s1534_s13 = sshll.u32 %s2132_s22, 8 }
  0x6c   : > { %2048 = vsyncadd (%p2386_p8), [#allocation6], 4294955008  ;;  %v1809_v1 = vld [vmem:[#allocation5] sm:$0xff]   ;;  %1535 = vmatprep.subr.bf16.mxu0 %v1808_v0  ;;  %v1813_v5 = vld [vmem:[#allocation5 + $0x8] sm:$0xff]   ;;  %s272_s29 = scalar_lea.vmem [#allocation8], %s1436_s12  ;;  %s2321_s14 = scalar_lea.hbm %s2373_s5, %s1534_s13 }
  0x6d   : > { %v1810_v2 = vld [vmem:[#allocation5 + $0xc0] sm:$0xff]   ;;  %1536 = vmatpush3.bf16.msra.mxu0 %v1809_v1  ;;  %v1814_v6 = vld [vmem:[#allocation5 + $0xc8] sm:$0xff]   ;;  %v1817_v9 = vld [vmem:[#allocation5 + $0x10] sm:$0xff]   ;;  %s1333_s7 = sshll.u32 %s272_s29, 4  ;;  %s1320_s22 = scalar_lea.sflag [#allocation4], %s2283_s17  ;;  %s2323_s7 = int_to_ptr.vmem [resolvable:$true] %s1333_s7 }
  0x6e   : > { %v1811_v3 = vld [vmem:[#allocation5 + $0x80] sm:$0xff]   ;;  %1557 = vmatprep.subr.bf16.mxu1 %v1810_v2  ;;  %1537 = vmatprep.subr.bf16.mxu0 %v1812_v4  ;;  %v1815_v7 = vld [vmem:[#allocation5 + $0x88] sm:$0xff]   ;;  %v1818_v10 = vld [vmem:[#allocation5 + $0xd0] sm:$0xff]   ;;  %s1997_s15 = scalar_lea.vmem %s2323_s7, 256  ;;  %p2387_p0 = scmp.ne.s32.totalorder %s2382_s30, 0 }
  0x6f   : > { %1558 = vmatpush3.bf16.msra.mxu1 %v1811_v3  ;;  %v1819_v11 = vld [vmem:[#allocation5 + $0x90] sm:$0xff]   ;;  %v1820_v12 = vld [vmem:[#allocation5 + $0x58] sm:$0xff]   ;;  %v1824_v16 = vld [vmem:[#allocation5 + $0x60] sm:$0xff]   ;;  %p1998_p11 = scmp.ne.s32.totalorder %s2323_s7, %s1997_s15  ;;  %s2078_s23 = smov [#allocation8]  }
  0x70   : > { %1559 = vmatprep.subr.bf16.mxu1 %v1814_v6  ;;  %v1821_v13 = vld [vmem:[#allocation5 + $0x18] sm:$0xff]   ;;  %v1825_v17 = vld [vmem:[#allocation5 + $0x20] sm:$0xff]   ;;  %v1828_v20 = vld [vmem:[#allocation5 + $0x68] sm:$0xff]   ;;  %s2001_s6 = sshll.u32 %s2078_s23, 4  ;;  %s2002_s6 = int_to_ptr.vmem [resolvable:$false] %s2001_s6 }
  0x71   : > { %1538 = vmatpush3.bf16.msra.mxu0 %v1813_v5  ;;  %v1822_v14 = vld [vmem:[#allocation5 + $0xd8] sm:$0xff]   ;;  %v1826_v18 = vld [vmem:[#allocation5 + $0xe0] sm:$0xff]   ;;  %v1829_v21 = vld [vmem:[#allocation5 + $0x28] sm:$0xff]   ;;  %p1999_p1 = pnand %p1998_p11, %p2387_p0  ;;  %p2004_p5 = scmp.lt.s32.totalorder %s2323_s7, %s2002_s6 }
  0x72   : > { %1539 = vmatprep.subr.bf16.mxu0 %v1816_v8  ;;  %v1823_v15 = vld [vmem:[#allocation5 + $0x98] sm:$0xff]   ;;  %v1827_v19 = vld [vmem:[#allocation5 + $0xa0] sm:$0xff]   ;;  %v1830_v22 = vld [vmem:[#allocation5 + $0xe8] sm:$0xff]  }
  0x73   : > { %1560 = vmatpush3.bf16.msra.mxu1 %v1815_v7  ;;  %v1831_v23 = vld [vmem:[#allocation5 + $0xa8] sm:$0xff]   ;;  %v1832_v24 = vld [vmem:[#allocation5 + $0x70] sm:$0xff]   ;;  %v1836_v28 = vld [vmem:[#allocation5 + $0x78] sm:$0xff]   ;;  %p2000_p3 = pneg %p1999_p1 }
  0x74   : > { %1561 = vmatprep.subr.bf16.mxu1 %v1818_v10  ;;  %v1833_v25 = vld [vmem:[#allocation5 + $0x30] sm:$0xff]   ;;  %v1837_v29 = vld [vmem:[#allocation5 + $0x38] sm:$0xff]   ;;  %v1843_v34 = vld [vmem:[#allocation5 + $0x140] sm:$0xff]  }
  0x75   : > { %1540 = vmatpush3.bf16.msra.mxu0 %v1817_v9  ;;  %v1834_v26 = vld [vmem:[#allocation5 + $0xf0] sm:$0xff]   ;;  %v1838_v30 = vld [vmem:[#allocation5 + $0xf8] sm:$0xff]   ;;  %v1847_v37 = vld [vmem:[#allocation5 + $0x100] sm:$0xff]  }
  0x76   : > { %1541 = vmatprep.subr.bf16.mxu0 %v1820_v12  ;;  %v1835_v27 = vld [vmem:[#allocation5 + $0xb0] sm:$0xff]   ;;  %v1842_v33 = vld [vmem:[#allocation5 + $0xb8] sm:$0xff]   ;;  %v1848_v38 = vld [vmem:[#allocation5 + $0x1c0] sm:$0xff]  }
  0x77   : > { %1562 = vmatpush3.bf16.msra.mxu1 %v1819_v11  ;;  %v1839_v31 = vld [vmem:[%s2287_s9] ss:$40 sps:$4 sm:$0xff]   ;;  %v1841_v32 = vld [vmem:[%s2287_s9 + $0x4] ss:$40 sps:$4 sm:$0xff]   ;;  %v1877_v3 = vld [vmem:[%s2287_s9 + $0x10] ss:$40 sps:$4 sm:$0xff]  }
  0x78   : > { %1563 = vmatprep.subr.bf16.mxu1 %v1822_v14  ;;  %1015 = vmatprep.mubr.bf16.mxu0 %v1841_v32  ;;  %v1844_v35 = vld [vmem:[%s2287_s9 + $0x8] ss:$40 sps:$4 sm:$0xff]   ;;  %v1846_v36 = vld [vmem:[%s2287_s9 + $0xc] ss:$40 sps:$4 sm:$0xff]   ;;  %v1882_v7 = vld [vmem:[%s2287_s9 + $0x18] ss:$40 sps:$4 sm:$0xff]  }
  0x79   : > { %1542 = vmatpush3.bf16.msra.mxu0 %v1821_v13  ;;  %1056 = vmatprep.mubr.bf16.mxu1 %v1846_v36  ;;  %v1849_v39 = vld [vmem:[#allocation5 + $0x180] sm:$0xff]   ;;  %v1850_v40 = vld [vmem:[#allocation5 + $0x148] sm:$0xff]   ;;  %v1854_v44 = vld [vmem:[#allocation5 + $0x150] sm:$0xff]  }
  0x7a   : > { %1543 = vmatprep.subr.bf16.mxu0 %v1824_v16  ;;  %v1851_v41 = vld [vmem:[#allocation5 + $0x108] sm:$0xff]   ;;  %v1855_v45 = vld [vmem:[#allocation5 + $0x110] sm:$0xff]   ;;  %v1858_v48 = vld [vmem:[#allocation5 + $0x158] sm:$0xff]  }
  0x7b   : > { %1564 = vmatpush3.bf16.msra.mxu1 %v1823_v15  ;;  %v1852_v42 = vld [vmem:[#allocation5 + $0x1c8] sm:$0xff]   ;;  %v1856_v46 = vld [vmem:[#allocation5 + $0x1d0] sm:$0xff]   ;;  %v1859_v49 = vld [vmem:[#allocation5 + $0x118] sm:$0xff]  }
  0x7c   : > { %1565 = vmatprep.subr.bf16.mxu1 %v1826_v18  ;;  %v1853_v43 = vld [vmem:[#allocation5 + $0x188] sm:$0xff]   ;;  %v1857_v47 = vld [vmem:[#allocation5 + $0x190] sm:$0xff]   ;;  %v1860_v50 = vld [vmem:[#allocation5 + $0x1d8] sm:$0xff]  }
  0x7d   : > { %1544 = vmatpush3.bf16.msra.mxu0 %v1825_v17  ;;  %v1861_v51 = vld [vmem:[#allocation5 + $0x198] sm:$0xff]   ;;  %v1862_v52 = vld [vmem:[#allocation5 + $0x160] sm:$0xff]   ;;  %v1866_v56 = vld [vmem:[#allocation5 + $0x168] sm:$0xff]  }
  0x7e   : > { %1545 = vmatprep.subr.bf16.mxu0 %v1828_v20  ;;  %v1863_v53 = vld [vmem:[#allocation5 + $0x120] sm:$0xff]   ;;  %v1867_v57 = vld [vmem:[#allocation5 + $0x128] sm:$0xff]   ;;  %v1870_v60 = vld [vmem:[#allocation5 + $0x170] sm:$0xff]  }
  0x7f   : > { %1566 = vmatpush3.bf16.msra.mxu1 %v1827_v19  ;;  %v1864_v54 = vld [vmem:[#allocation5 + $0x1e0] sm:$0xff]   ;;  %v1868_v58 = vld [vmem:[#allocation5 + $0x1e8] sm:$0xff]   ;;  %v1871_v61 = vld [vmem:[#allocation5 + $0x130] sm:$0xff]  }
  0x80   : > { %1567 = vmatprep.subr.bf16.mxu1 %v1830_v22  ;;  %v1865_v55 = vld [vmem:[#allocation5 + $0x1a0] sm:$0xff]   ;;  %v1869_v59 = vld [vmem:[#allocation5 + $0x1a8] sm:$0xff]   ;;  %v1872_v62 = vld [vmem:[#allocation5 + $0x1f0] sm:$0xff]  }
  0x81   : > { %1546 = vmatpush3.bf16.msra.mxu0 %v1829_v21  ;;  %v1873_v63 = vld [vmem:[#allocation5 + $0x1b0] sm:$0xff]   ;;  %v1874_v0 = vld [vmem:[#allocation5 + $0x178] sm:$0xff]   ;;  %v1881_v6 = vld [vmem:[#allocation5 + $0x240] sm:$0xff]  }
  0x82   : > { %1547 = vmatprep.subr.bf16.mxu0 %v1832_v24  ;;  %v1875_v1 = vld [vmem:[#allocation5 + $0x138] sm:$0xff]   ;;  %v1885_v9 = vld [vmem:[#allocation5 + $0x200] sm:$0xff]   ;;  %v1886_v10 = vld [vmem:[#allocation5 + $0x248] sm:$0xff]  }
  0x83   : > { %1568 = vmatpush3.bf16.msra.mxu1 %v1831_v23  ;;  %v1876_v2 = vld [vmem:[#allocation5 + $0x1f8] sm:$0xff]   ;;  %v1887_v11 = vld [vmem:[#allocation5 + $0x208] sm:$0xff]   ;;  %v1888_v12 = vld [vmem:[#allocation5 + $0x250] sm:$0xff]  }
  0x84   : > { %1569 = vmatprep.subr.bf16.mxu1 %v1834_v26  ;;  %v1879_v4 = vld [vmem:[%s2287_s9 + $0x14] ss:$40 sps:$4 sm:$0xff]   ;;  %v1902_v19 = vld [vmem:[%s2287_s9 + $0x24] ss:$40 sps:$4 sm:$0xff]  }
  0x85   : > { %1548 = vmatpush3.bf16.msra.mxu0 %v1833_v25  ;;  %v1880_v5 = vld [vmem:[#allocation5 + $0x1b8] sm:$0xff]   ;;  %v1889_v13 = vld [vmem:[#allocation5 + $0x210] sm:$0xff]   ;;  %v1892_v16 = vld [vmem:[#allocation5 + $0x260] sm:$0xff]  }
  0x86   : > { %1549 = vmatprep.subr.bf16.mxu0 %v1836_v28  ;;  %v1884_v8 = vld [vmem:[%s2287_s9 + $0x1c] ss:$40 sps:$4 sm:$0xff]   ;;  %v1900_v25 = vld [vmem:[%s2287_s9 + $0x20] ss:$40 sps:$4 sm:$0xff]   ;;  %s2003_s9 = scalar_lea.vmem %s2002_s6, 512 }
  0x87   : > { %1570 = vmatpush3.bf16.msra.mxu1 %v1835_v27  ;;  %v1890_v14 = vld [vmem:[#allocation5 + $0x258] sm:$0xff]   ;;  %v1893_v17 = vld [vmem:[#allocation5 + $0x220] sm:$0xff]   ;;  %v1894_v18 = vld [vmem:[#allocation5 + $0x268] sm:$0xff]   ;;  %p2005_p9 = scmp.lt.s32.totalorder %s2003_s9, %s1997_s15 }
  0x88   : > { %1571 = vmatprep.subr.bf16.mxu1 %v1838_v30  ;;  %v1891_v15 = vld [vmem:[#allocation5 + $0x218] sm:$0xff]   ;;  %v1895_v20 = vld [vmem:[#allocation5 + $0x228] sm:$0xff]   ;;  %v1896_v21 = vld [vmem:[#allocation5 + $0x270] sm:$0xff]  }
  0x89   : > { %1550 = vmatpush3.bf16.msra.mxu0 %v1837_v29  ;;  %v1897_v22 = vld [vmem:[#allocation5 + $0x230] sm:$0xff]   ;;  %v1898_v23 = vld [vmem:[#allocation5 + $0x278] sm:$0xff]   ;;  %v1190_v26 = vld [vmem:[#allocation7] sm:$0xff]  ;;  %p2006_p12 = por %p2005_p9, %p2004_p5 }
  0x8a   : > { %1579 = vmatprep.subr.bf16.mxu0 %v1843_v34  ;;  %v1899_v24 = vld [vmem:[#allocation5 + $0x238] sm:$0xff]   ;;  %v1191_v27 = vld [vmem:[#allocation7 + $0x8] sm:$0xff]  ;;  %v1192_v28 = vld [vmem:[#allocation7 + $0x10] sm:$0xff] }
  0x8b   : > { %1572 = vmatpush3.bf16.msra.mxu1 %v1842_v33  ;;  %v1698_v29 = vpack.c.bf16 %v1191_v27, %v1190_v26  ;;  %v1193_v30 = vld [vmem:[#allocation7 + $0x18] sm:$0xff]  ;;  %v1194_v32 = vld [vmem:[#allocation7 + $0x20] sm:$0xff]  ;;  %v1195_v33 = vld [vmem:[#allocation7 + $0x28] sm:$0xff]  ;;  %p2007_p2 = pnand %p2006_p12, %p2000_p3 }
  0x8c   : > { %1016 = vmatmul.mubr.bf16.vlgmr.msra.gmra.mrb[0].mxu0 %v1839_v31  ;;  %1601 = vmatprep.subr.bf16.mxu1 %v1848_v38  ;;  %v1702_v31 = vpack.c.bf16 %v1193_v30, %v1192_v28  ;;  %v1706_v34 = vpack.c.bf16 %v1195_v33, %v1194_v32  ;;  %v1197_v36 = vld [vmem:[#allocation7 + $0x38] sm:$0xff]  ;;  %v1198_v38 = vld [vmem:[#allocation7 + $0x40] sm:$0xff] }
  0x8d   : > { %1580 = vmatpush3.bf16.msra.mxu0 %v1847_v37  ;;  %1097 = vmatprep.mubr.bf16.mxu0 %v1879_v4 }
  0x8e   : > { %1057 = vmatmul.mubr.bf16.vlgmr.msra.gmra.mrb[0].mxu1 %v1844_v35  ;;  %1581 = vmatprep.subr.bf16.mxu0 %v1850_v40  ;;  %v1196_v35 = vld [vmem:[#allocation7 + $0x30] sm:$0xff] }
  0x8f   : > { %1602 = vmatpush3.bf16.msra.mxu1 %v1849_v39  ;;  %1138 = vmatprep.mubr.bf16.mxu1 %v1884_v8  ;;  %v1710_v37 = vpack.c.bf16 %v1197_v36, %v1196_v35  ;;  %v1199_v39 = vld [vmem:[#allocation7 + $0x48] sm:$0xff] }
  0x90   : > { %1603 = vmatprep.subr.bf16.mxu1 %v1852_v42  ;;  %v1714_v40 = vpack.c.bf16 %v1199_v39, %v1198_v38  ;;  %v1201_v42 = vld [vmem:[#allocation7 + $0x58] sm:$0xff] }
  0x91   : > { %1582 = vmatpush3.bf16.msra.mxu0 %v1851_v41  ;;  %v1200_v41 = vld [vmem:[#allocation7 + $0x50] sm:$0xff] }
  0x92   : > { %1583 = vmatprep.subr.bf16.mxu0 %v1854_v44  ;;  %v1202_v44 = vld [vmem:[#allocation7 + $0x60] sm:$0xff] }
  0x93   : > { %1604 = vmatpush3.bf16.msra.mxu1 %v1853_v43  ;;  %v1718_v43 = vpack.c.bf16 %v1201_v42, %v1200_v41 }
  0x94   : > { %1605 = vmatprep.subr.bf16.mxu1 %v1856_v46 }
  0x95   : > { %1584 = vmatpush3.bf16.msra.mxu0 %v1855_v45  ;;  %v1203_v45 = vld [vmem:[#allocation7 + $0x68] sm:$0xff] }
  0x96   : > { %1585 = vmatprep.subr.bf16.mxu0 %v1858_v48  ;;  %v1722_v46 = vpack.c.bf16 %v1203_v45, %v1202_v44  ;;  %v1205_v48 = vld [vmem:[#allocation7 + $0x78] sm:$0xff] }
  0x97   : > { %1606 = vmatpush3.bf16.msra.mxu1 %v1857_v47  ;;  %v1204_v47 = vld [vmem:[#allocation7 + $0x70] sm:$0xff] }
  0x98   : > { %1607 = vmatprep.subr.bf16.mxu1 %v1860_v50 }
  0x99   : > { %1586 = vmatpush3.bf16.msra.mxu0 %v1859_v49  ;;  %v1726_v49 = vpack.c.bf16 %v1205_v48, %v1204_v47 }
  0x9a   : > { %1587 = vmatprep.subr.bf16.mxu0 %v1862_v52 }
  0x9b   : > { %1608 = vmatpush3.bf16.msra.mxu1 %v1861_v51  ;;  %v1437_v51 = vld [vmem:[%s2370_s2] ss:$0 sm:$0xff] }
  0x9c   : > { %1609 = vmatprep.subr.bf16.mxu1 %v1864_v54 }
  0x9d   : > { %1588 = vmatpush3.bf16.msra.mxu0 %v1863_v53 }
  0x9e   : > { %1589 = vmatprep.subr.bf16.mxu0 %v1866_v56 }
  0x9f   : > { %1610 = vmatpush3.bf16.msra.mxu1 %v1865_v55 }
  0xa0   : > { %1611 = vmatprep.subr.bf16.mxu1 %v1868_v58 }
  0xa1   : > { %1590 = vmatpush3.bf16.msra.mxu0 %v1867_v57 }
  0xa2   : > { %1591 = vmatprep.subr.bf16.mxu0 %v1870_v60 }
  0xa3   : > { %1612 = vmatpush3.bf16.msra.mxu1 %v1869_v59 }
  0xa4   : > { %1613 = vmatprep.subr.bf16.mxu1 %v1872_v62 }
  0xa5   : > { %1592 = vmatpush3.bf16.msra.mxu0 %v1871_v61 }
  0xa6   : > { %1593 = vmatprep.subr.bf16.mxu0 %v1874_v0 }
  0xa7   : > { %1614 = vmatpush3.bf16.msra.mxu1 %v1873_v63 }
  0xa8   : > { %1615 = vmatprep.subr.bf16.mxu1 %v1876_v2 }
  0xa9   : > { %1594 = vmatpush3.bf16.msra.mxu0 %v1875_v1 }
  0xaa   : > { %1623 = vmatprep.subr.bf16.mxu0 %v1881_v6 }
  0xab   : > { %1616 = vmatpush3.bf16.msra.mxu1 %v1880_v5 }
  0xac   : > { %1098 = vmatmul.mubr.bf16.vlgmr.msra.gmra.mrb[4].mxu0 %v1877_v3  ;;  %1699 = vmatprep.subr.bf16.mxu1 %v1698_v29 }
  0xad   : > { %1624 = vmatpush3.bf16.msra.mxu0 %v1885_v9  ;;  %1179 = vmatprep.mubr.bf16.mxu0 %v1902_v19 }
  0xae   : > { %1139 = vmatmul.mubr.bf16.vlgmr.msra.gmra.mrb[4].mxu1 %v1882_v7  ;;  %1625 = vmatprep.subr.bf16.mxu0 %v1886_v10 }
  0xaf   : > { %1701 = vmatpush3.bf16.msra.mxu1 %v1698_v29  ;;  %v1288_v29 = vlaneseq }
  0xb0   : > { %1703 = vmatprep.subr.bf16.mxu1 %v1702_v31 }
  0xb1   : > { %1626 = vmatpush3.bf16.msra.mxu0 %v1887_v11  ;;  %v1289_v30 = vand.u32 127, %v1288_v29 }
  0xb2   : > { %1627 = vmatprep.subr.bf16.mxu0 %v1888_v12 }
  0xb3   : > { %1705 = vmatpush3.bf16.msra.mxu1 %v1702_v31  ;;  %v1528_v31 = vld [vmem:[%s2372_s4] ss:$0 sm:$0xff]  ;;  %vm1290_vm0 = vcmp.lt.s32.totalorder %v1289_v30, 4 }
  0xb4   : > { %1707 = vmatprep.subr.bf16.mxu1 %v1706_v34 }
  0xb5   : > { %1628 = vmatpush3.bf16.msra.mxu0 %v1889_v13 }
  0xb6   : > { %1629 = vmatprep.subr.bf16.mxu0 %v1890_v14 }
  0xb7   : > { %1709 = vmatpush3.bf16.msra.mxu1 %v1706_v34 }
  0xb8   : > { %1711 = vmatprep.subr.bf16.mxu1 %v1710_v37 }
  0xb9   : > { %1630 = vmatpush3.bf16.msra.mxu0 %v1891_v15 }
  0xba   : > { %1631 = vmatprep.subr.bf16.mxu0 %v1892_v16 }
  0xbb   : > { %1713 = vmatpush3.bf16.msra.mxu1 %v1710_v37 }
  0xbc   : > { %1715 = vmatprep.subr.bf16.mxu1 %v1714_v40 }
  0xbd   : > { %1632 = vmatpush3.bf16.msra.mxu0 %v1893_v17 }
  0xbe   : > { %1633 = vmatprep.subr.bf16.mxu0 %v1894_v18 }
  0xbf   : > { %1717 = vmatpush3.bf16.msra.mxu1 %v1714_v40 }
  0xc0   : > { %1719 = vmatprep.subr.bf16.mxu1 %v1718_v43 }
  0xc1   : > { %1634 = vmatpush3.bf16.msra.mxu0 %v1895_v20 }
  0xc2   : > { %1635 = vmatprep.subr.bf16.mxu0 %v1896_v21 }
  0xc3   : > { %1721 = vmatpush3.bf16.msra.mxu1 %v1718_v43 }
  0xc4   : > { %1723 = vmatprep.subr.bf16.mxu1 %v1722_v46 }
  0xc5   : > { %1636 = vmatpush3.bf16.msra.mxu0 %v1897_v22 }
  0xc6   : > { %1637 = vmatprep.subr.bf16.mxu0 %v1898_v23 }
  0xc7   : > { %1725 = vmatpush3.bf16.msra.mxu1 %v1722_v46 }
  0xc8   : > { %1727 = vmatprep.subr.bf16.mxu1 %v1726_v49 }
  0xc9   : > { %1638 = vmatpush3.bf16.msra.mxu0 %v1899_v24 }
  0xcb   : > { %1729 = vmatpush3.bf16.msra.mxu1 %v1726_v49 }
  0xcc   : > { %1180 = vmatmul.mubr.bf16.vlgmr.msra.gmra.mrb[8].mxu0 %v1900_v25 }
 0x15f   : > { %v1551_v50 = vpop.f32.mrb[0].mxu0 }
 0x160   : > { %v1552_v52 = vpop.f32.mrb[1].mxu0 }
 0x161   : > { %v1553_v53 = vadd.f32 %v1552_v52, %v1551_v50  ;;  %v1554_v54 = vpop.f32.mrb[2].mxu0  ;;  %v1573_v55 = vpop.f32.mrb[0].mxu1 }
 0x162   : > { %v1555_v56 = vpop.f32.mrb[3].mxu0  ;;  %v1574_v59 = vpop.f32.mrb[1].mxu1 }
 0x163   : > { %v1018_v57 = vadd.f32 %v1553_v53, %v1437_v51  ;;  %v1556_v58 = vadd.f32 %v1555_v56, %v1554_v54  ;;  %v1575_v60 = vadd.f32 %v1574_v59, %v1573_v55  ;;  %v1576_v61 = vpop.f32.mrb[2].mxu1 }
 0x164   : > { %v1577_v63 = vpop.f32.mrb[3].mxu1 }
 0x165   : > { %v1021_v62 = vadd.f32 %v1556_v58, %v1437_v51  ;;  %v1059_v0 = vadd.f32 %v1575_v60, %v1018_v57  ;;  %v1578_v1 = vadd.f32 %v1577_v63, %v1576_v61 }
 0x167   : > { %v1062_v2 = vadd.f32 %v1578_v1, %v1021_v62 }
 0x17f   : > { %v1595_v3 = vpop.f32.mrb[4].mxu0 }
 0x180   : > { %v1596_v4 = vpop.f32.mrb[5].mxu0 }
 0x181   : > { %v1597_v5 = vadd.f32 %v1596_v4, %v1595_v3  ;;  %v1598_v6 = vpop.f32.mrb[6].mxu0  ;;  %v1617_v9 = vpop.f32.mrb[4].mxu1 }
 0x182   : > { %v1599_v7 = vpop.f32.mrb[7].mxu0  ;;  %v1618_v11 = vpop.f32.mrb[5].mxu1 }
 0x183   : > { %v1100_v8 = vadd.f32 %v1597_v5, %v1059_v0  ;;  %v1600_v10 = vadd.f32 %v1599_v7, %v1598_v6  ;;  %v1619_v13 = vadd.f32 %v1618_v11, %v1617_v9  ;;  %v1620_v14 = vpop.f32.mrb[6].mxu1 }
 0x184   : > { %v1621_v15 = vpop.f32.mrb[7].mxu1 }
 0x185   : > { %v1103_v12 = vadd.f32 %v1600_v10, %v1062_v2  ;;  %v1141_v16 = vadd.f32 %v1619_v13, %v1100_v8  ;;  %v1622_v17 = vadd.f32 %v1621_v15, %v1620_v14 }
 0x187   : > { %v1144_v18 = vadd.f32 %v1622_v17, %v1103_v12 }
 0x19f   : > { %v1639_v19 = vpop.f32.mrb[8].mxu0 }
 0x1a0   : > { %v1640_v20 = vpop.f32.mrb[9].mxu0 }
 0x1a1   : > { %v1641_v21 = vadd.f32 %v1640_v20, %v1639_v19  ;;  %v1642_v22 = vpop.f32.mrb[10].mxu0 }
 0x1a2   : > { %v1643_v23 = vpop.f32.mrb[11].mxu0 }
 0x1a3   : > { %v1182_v24 = vadd.f32 %v1641_v21, %v1141_v16  ;;  %v1644_v25 = vadd.f32 %v1643_v23, %v1642_v22 }
 0x1a5   : > { %v1188_v26 = vmax.f32 %v1182_v24, 0.0  ;;  %v1185_v27 = vadd.f32 %v1644_v25, %v1144_v18 }
 0x1a7   : > { %v1189_v28 = vmax.f32 %v1185_v27, 0.0  ;;  %1695 = vmatprep.mubr.f32.mxu1 %v1188_v26 }
 0x1a9   : > { %1696 = vmatmul.mubr.f32.vlgmr.msra.gmra.mrb[8].mxu1 %v1189_v28 }
 0x27c   : > { %v1697_v32 = vpop.f32.mrb[8].mxu1 }
 0x27d   : > { %v1279_v33 = vpop.f32.mrb[9].mxu1  ;;  %v1285_v35 = vadd.f32 %v1697_v32, %v1528_v31 }
 0x27e   : > { %v1280_v34 = vadd.f32 %v1528_v31, %v1279_v33 }
 0x27f   : > { %v1292_v37 = vsel %vm1290_vm0, %v1285_v35, -inf }
 0x280   : > { %v1291_v36 = vsel %vm1290_vm0, %v1280_v34, -inf }
 0x281   : > { %1293 = vmax.xlane.f32.xlu0 %v1291_v36 }
 0x285   : > { %1295 = vmax.xlane.f32.xlu0 %v1292_v37 }
 0x30e   : > { %v1294_v38 = vpop.xlane.xlu0 %1293 }
 0x30f   : > { %v1297_v39 = vsub.f32 %v1291_v36, %v1294_v38 }
 0x311   : > { %v1299_v40 = vmul.f32 1.442695, %v1297_v39 }
 0x312   : > { %v1296_v41 = vpop.xlane.xlu0 %1295 }
 0x313   : > { %v1298_v42 = vsub.f32 %v1292_v37, %v1296_v41  ;;  %1903 = vpow2.f32 %v1299_v40 }
 0x315   : > { %v1301_v43 = vmul.f32 1.442695, %v1298_v42 }
 0x317   : > { %1905 = vpow2.f32 %v1301_v43 }
 0x31d   : > { %v1904_v44 = vpop.eup %1903 }
 0x31e   : > { %1303 = vadd.xlane.f32.xlu1 %v1904_v44 }
 0x321   : > { %v1906_v45 = vpop.eup %1905 }
 0x322   : > { %1305 = vadd.xlane.f32.xlu1 %v1906_v45 }
 0x3ab   : > { %v1304_v46 = vpop.xlane.xlu1 %1303 }
 0x3ac   : > { %1907 = vlog2.f32 %v1304_v46 }
 0x3af   : > { %v1306_v47 = vpop.xlane.xlu1 %1305 }
 0x3b0   : > { %1909 = vlog2.f32 %v1306_v47 }
 0x3b6   : > { %v1908_v48 = vpop.eup %1907 }
 0x3b7   : > { %v1308_v49 = vmul.f32 0.6931472, %v1908_v48 }
 0x3b9   : > { %v1311_v50 = vadd.f32 %v1308_v49, %v1294_v38 }
 0x3ba   : > { %v1910_v51 = vpop.eup %1909 }
 0x3bb   : > { %v1313_v52 = vsub.f32 %v1280_v34, %v1311_v50  ;;  %v1310_v53 = vmul.f32 0.6931472, %v1910_v51 }
 0x3bd   : > { %v1315_v54 = vsel %vm1290_vm0, %v1313_v52, %v1280_v34  ;;  %v1312_v55 = vadd.f32 %v1310_v53, %v1296_v41 }
 0x3be   : > { %1317 = vst [vmem:[%s272_s29] sm:$0xff] %v1315_v54 }
 0x3bf   : > { %v1314_v56 = vsub.f32 %v1285_v35, %v1312_v55 }
 0x3c1   : > { %v1316_v57 = vsel %vm1290_vm0, %v1314_v56, %v1285_v35 }
 0x3c2   : > { %1318 = vst [vmem:[%s272_s29 + $0x8] sm:$0xff] %v1316_v57 }
 0x3c3   : > { %2010 = shalt.err (!%p2007_p2)
}
 0x3c4   : > { %s2011_s24 = scalar_lea.hbm %s2321_s14, 256  ;;  %s2015_s11 = scalar_lea.hbm %s2373_s5, 512 }
 0x3c5   : > { %p2012_p13 = scmp.ne.s32.totalorder %s2321_s14, %s2011_s24  ;;  %p2016_p4 = scmp.lt.u32.totalorder %s2321_s14, %s2373_s5 }
 0x3c6   : > { %p2017_p7 = scmp.lt.u32.totalorder %s2015_s11, %s2011_s24  ;;  %p2019_p11 = scmp.lt.u32.totalorder %s2011_s24, %s2321_s14 }
 0x3c7   : > { %p2013_p6 = pnand %p2012_p13, %p2387_p0 }
 0x3c8   : > { %p2018_p8 = por %p2017_p7, %p2016_p4 }
 0x3c9   : > { %p2014_p10 = pneg %p2013_p6 }
 0x3ca   : > { %p2020_p1 = por %p2019_p11, %p2018_p8 }
 0x3cc   : > { %p2021_p3 = pnand %p2020_p1, %p2014_p10 }
 0x3ce   : > { %2024 = shalt.err (!%p2021_p3)
}
 0x3cf   : > { %s2079_s29 = smov 128   ;;  %s2080_s10 = smov 8  }
 0x3d0   : > { %1743 = dma.vmem_to_hbm [thread:$0]  (%p2387_p0), %s2323_s7, 256, %s2321_s14, %s1320_s22, %s2079_s29, %s2079_s29, %s2080_s10  }
 0x3d1 PF: > { %s1348_s28 = sand.u32 1, %s2055_s18   ;;  %p2388_p5 = scmp.ne.s32.totalorder %s2378_s25, 0 }
 0x3d2   : > { %p2389_p9 = scmp.ge.s32.totalorder %s2067_s21, 2  ;;  %s1349_s15 = scalar_lea.sflag [#allocation4], %s1348_s28 }
 0x3d4   : > { %p1757_p12 = pnand %p2389_p9, %p2388_p5 }
 0x3d6   : > { %2050 = dma.done.wait (!%p1757_p12), %s1349_s15, 256  }
 0x3d7   : > { %2052 = vsyncadd (!%p1757_p12), %s1349_s15, 4294967040  ;;  %p19_p2 = scmp.ge.s32.totalorder %s2221_s16, 4   ;;  %s2390_s18 = smov %s2059_s19 }
 0x3d8   : > { %s2391_s19 = smov %s2063_s20  ;;  %s2392_s20 = smov %s2230_s27 }
 0x3d9   : > { %s2393_s21 = smov %s2221_s16  ;;  %21 = sbr.rel (!%p19_p2) target bundleno = 6 (0x6), region = 93 }
 0x3e0   :  { %1354 = vsyncpa [#allocation3], 1 }
 0x3e1   :  { %1356 = vsyncpa [#allocation3 + $0x1], 1 }
 0x3e2   :  { %1357 = vsyncpa [#allocation6], 1 }
 0x3e3   :  { %1358 = vsyncpa [#allocation4], 1 }
 0x3e4   :  { %1360 = vsyncpa [#allocation4 + $0x1], 1 }

</bundles_post_ra>
